<compile_context>
chip_gen: v7x
topology: tpu7x:2x2x1
jax: 0.10.0
libtpu: 0.0.40
codegen_flags: <defaults>
</compile_context>

<pallas_src>
import jax
import jax.numpy as jnp
from jax.experimental import pallas as pl
from jax.experimental.pallas import tpu as pltpu


def _make_kernel(alpha: float, tile_b: int, num_classes: int):
    alpha = float(alpha)
    C = num_classes
    clamp_lo, clamp_hi = 1e-12, 1e12
    # PyTorch clamps the *masked* distmat: each of the C-1 zero entries per row is
    # clamped up to 1e-12 and summed as well -> constant per-row offset.
    masked_zero_term = float((C - 1) * clamp_lo)

    def kernel(labels_sref,    # (B,)      int32  SMEM (scalar prefetch)
               logits_ref,     # (tile_b,C)        VMEM (auto-pipelined)
               lab_ref,        # (tile_b,1) int32  VMEM
               centers_hbm,    # (C,C)             HBM (pl.ANY)
               out_ref,        # (1,8,128) f32     VMEM (per-tile partial)
               cbuf,           # (tile_b,C)        VMEM scratch: gathered center rows
               sem):           # (tile_b,)         DMA semaphores
        i = pl.program_id(0)
        base = i * tile_b

        # ---- gather only the labeled center rows from HBM -------------------
        @pl.loop(0, tile_b)
        def _(r):
            lab = labels_sref[base + r]
            pltpu.make_async_copy(
                centers_hbm.at[pl.ds(lab, 1), :],
                cbuf.at[pl.ds(r, 1), :],
                sem.at[r],
            ).start()

        @pl.loop(0, tile_b)
        def _(r):
            pltpu.make_async_copy(
                centers_hbm.at[pl.ds(0, 1), :],
                cbuf.at[pl.ds(r, 1), :],
                sem.at[r],
            ).wait()

        # ---- compute (all f32 after load; inputs may be bf16) ----------------
        x = logits_ref[...].astype(jnp.float32)        # (tile_b, C)
        c_sel = cbuf[...].astype(jnp.float32)          # (tile_b, C) gathered rows
        lab_vec = lab_ref[...]                         # (tile_b, 1) int32

        # One-hot is kept ONLY for the picked-logit term (O(tile_b*C) VPU);
        # a per-row dynamic lane gather x[i, y_i] has no clean Mosaic lowering.
        cls = jax.lax.broadcasted_iota(jnp.int32, (tile_b, C), 1)
        onehot = (lab_vec == cls).astype(jnp.float32)

        # cross entropy: sum_i (logsumexp(x_i) - x_i[y_i])   (divided by B in wrapper)
        m = jnp.max(x, axis=1, keepdims=True)                                  # (tile_b,1)
        lse = m + jnp.log(jnp.sum(jnp.exp(x - m), axis=1, keepdims=True))      # (tile_b,1)
        picked = jnp.sum(x * onehot, axis=1, keepdims=True)                    # (tile_b,1)
        ce_part = lse - picked

        # center loss: only the labeled distmat entry per row, column layout throughout.
        x2 = jnp.sum(x * x, axis=1, keepdims=True)                             # (tile_b,1)
        c2 = jnp.sum(c_sel * c_sel, axis=1, keepdims=True)                     # (tile_b,1)
        cross = jnp.sum(x * c_sel, axis=1, keepdims=True)                      # (tile_b,1)
        d = jnp.clip(x2 + c2 - 2.0 * cross, clamp_lo, clamp_hi) + masked_zero_term

        partial = jnp.sum(ce_part + alpha * d)          # scalar partial for this tile
        out_ref[...] = jnp.full((1, 8, 128), partial, dtype=jnp.float32)

    return kernel


def cce_center_loss(logits, labels, centers, alpha, *, tile_b=None):
    """logits: (B, C), labels: (B,) int, centers: (C, C). Returns scalar f32 loss."""
    B, C = logits.shape
    if tile_b is None:
        tile_b = B if B <= 256 else 256
    # TODO(synk): pad / mask a ragged final tile when B % tile_b != 0.
    assert B % tile_b == 0, "B must be a multiple of tile_b"
    num_tiles = B // tile_b

    labels_i32 = labels.astype(jnp.int32)
    labels2d = labels_i32.reshape(B, 1)

    kernel = _make_kernel(alpha, tile_b, C)
    grid_spec = pltpu.PrefetchScalarGridSpec(
        num_scalar_prefetch=1,                               # labels -> SMEM
        grid=(num_tiles,),
        in_specs=[
            pl.BlockSpec((tile_b, C), lambda i, lab: (i, 0)),   # logits (native dtype)
            pl.BlockSpec((tile_b, 1), lambda i, lab: (i, 0)),   # labels, vector form
            pl.BlockSpec(memory_space=pl.ANY),                  # centers stay in HBM
        ],
        out_specs=pl.BlockSpec((1, 8, 128), lambda i, lab: (i, 0, 0)),
        scratch_shapes=[
            pltpu.VMEM((tile_b, C), centers.dtype),             # gathered center rows
            pltpu.SemaphoreType.DMA((tile_b,)),
        ],
    )
    partials = pl.pallas_call(
        kernel,
        out_shape=jax.ShapeDtypeStruct((num_tiles, 8, 128), jnp.float32),
        grid_spec=grid_spec,
        compiler_params=pltpu.CompilerParams(
            dimension_semantics=("parallel",)),                 # batch tiles independent
    )(labels_i32, logits, labels2d, centers)
    return jnp.sum(partials[:, 0, 0]) / B


def _reference(logits, labels, centers, alpha):
    B, C = logits.shape
    x = logits.astype(jnp.float32)
    c = centers.astype(jnp.float32)
    onehot = jax.nn.one_hot(labels, C, dtype=jnp.float32)
    lse = jax.nn.logsumexp(x, axis=1)
    ce = jnp.mean(lse - jnp.sum(x * onehot, axis=1))
    distmat = (jnp.sum(x ** 2, axis=1, keepdims=True)
               + jnp.sum(c ** 2, axis=1)[None, :]
               - 2.0 * x @ c.T)
    center = jnp.sum(jnp.clip(distmat * onehot, 1e-12, 1e12)) / B
    return ce + alpha * center


if __name__ == "__main__":
    B, NUM_CLASSES, ALPHA = 8, 16, 0.5

    key = jax.random.PRNGKey(0)
    k_logits, k_labels, k_centers = jax.random.split(key, 3)

    logits = jax.random.normal(k_logits, (B, NUM_CLASSES), dtype=jnp.float32)
    labels = jax.random.randint(k_labels, (B,), 0, NUM_CLASSES, dtype=jnp.int32)
    # deterministic init of CenterLoss centers (torch.randn -> standard normal)
    centers = jax.random.normal(k_centers, (NUM_CLASSES, NUM_CLASSES), dtype=jnp.float32)

    loss = cce_center_loss(logits, labels, centers, ALPHA)
    loss = jax.block_until_ready(loss)

    ref = _reference(logits, labels, centers, ALPHA)
    assert jnp.allclose(loss, ref, rtol=1e-5, atol=1e-5), (loss, ref)

    print("KERNEL_OK")
</pallas_src>

<mosaic_0001>
module attributes {stable_mosaic.version = 11 : i64} {
  func.func @kernel(%arg0: i32, %arg1: memref<8xi32, #tpu.memory_space<smem>>, %arg2: memref<8x16xf32, #tpu.memory_space<vmem>>, %arg3: memref<8x1xi32, #tpu.memory_space<vmem>>, %arg4: memref<16x16xf32, #tpu.memory_space<any>>, %arg5: memref<1x8x128xf32, #tpu.memory_space<vmem>>, %arg6: memref<8x16xf32, #tpu.memory_space<vmem>>, %arg7: memref<8x!tpu.dma_semaphore, #tpu.memory_space<semaphore_mem>>) attributes {dimension_semantics = [#tpu.dimension_semantics<parallel>], iteration_bounds = array<i64: 1>, scalar_prefetch = 1 : i64, scratch_operands = 2 : i64, tpu.core_type = #tpu.core_type<tc>, window_params = [{transform_indices = @transform_0, window_bounds = array<i64: 8, 16>}, {transform_indices = @transform_1, window_bounds = array<i64: 8, 1>}, {}, {transform_indices = @transform_3, window_bounds = array<i64: 1, 8, 128>}]} {
    %c8_i32 = arith.constant 8 : i32
    %0 = arith.muli %arg0, %c8_i32 : i32
    %c0_i32 = arith.constant 0 : i32
    %c8_i32_0 = arith.constant 8 : i32
    %1 = arith.addi %c0_i32, %c8_i32_0 : i32
    %c1_i32 = arith.constant 1 : i32
    scf.for %arg8 = %c0_i32 to %1 step %c1_i32  : i32 {
      %c1_i32_25 = arith.constant 1 : i32
      %52 = arith.muli %arg8, %c1_i32_25 : i32
      %c0_i32_26 = arith.constant 0 : i32
      %53 = arith.addi %c0_i32_26, %52 : i32
      %54 = arith.addi %0, %53 : i32
      %55 = arith.index_cast %54 : i32 to index
      %56 = memref.load %arg1[%55] : memref<8xi32, #tpu.memory_space<smem>>
      %c0_i32_27 = arith.constant 0 : i32
      %57 = tpu.memref_slice %arg4[%56, %c0_i32_27] : memref<16x16xf32, #tpu.memory_space<any>> -> memref<1x16xf32, #tpu.memory_space<any>>
      %c0_i32_28 = arith.constant 0 : i32
      %58 = tpu.memref_slice %arg6[%53, %c0_i32_28] : memref<8x16xf32, #tpu.memory_space<vmem>> -> memref<1x16xf32, #tpu.memory_space<vmem>>
      %59 = tpu.memref_slice %arg7[%53] : memref<8x!tpu.dma_semaphore, #tpu.memory_space<semaphore_mem>> -> memref<1x!tpu.dma_semaphore, #tpu.memory_space<semaphore_mem>>
      %60 = tpu.memref_squeeze %59 : memref<1x!tpu.dma_semaphore, #tpu.memory_space<semaphore_mem>> -> memref<!tpu.dma_semaphore, #tpu.memory_space<semaphore_mem>>
      tpu.enqueue_dma source(%57 : memref<1x16xf32, #tpu.memory_space<any>>) target(%58 : memref<1x16xf32, #tpu.memory_space<vmem>>) target_semaphore(%60 : memref<!tpu.dma_semaphore, #tpu.memory_space<semaphore_mem>>)
    }
    %c8_i32_1 = arith.constant 8 : i32
    %c0_i32_2 = arith.constant 0 : i32
    %c8_i32_3 = arith.constant 8 : i32
    %2 = arith.addi %c0_i32_2, %c8_i32_3 : i32
    %c1_i32_4 = arith.constant 1 : i32
    scf.for %arg8 = %c0_i32_2 to %2 step %c1_i32_4  : i32 {
      %c1_i32_25 = arith.constant 1 : i32
      %52 = arith.muli %arg8, %c1_i32_25 : i32
      %c0_i32_26 = arith.constant 0 : i32
      %53 = arith.addi %c0_i32_26, %52 : i32
      %c0_i32_27 = arith.constant 0 : i32
      %c0_i32_28 = arith.constant 0 : i32
      %54 = tpu.memref_slice %arg4[%c0_i32_27, %c0_i32_28] : memref<16x16xf32, #tpu.memory_space<any>> -> memref<1x16xf32, #tpu.memory_space<any>>
      %c0_i32_29 = arith.constant 0 : i32
      %55 = tpu.memref_slice %arg6[%53, %c0_i32_29] : memref<8x16xf32, #tpu.memory_space<vmem>> -> memref<1x16xf32, #tpu.memory_space<vmem>>
      %56 = tpu.memref_slice %arg7[%53] : memref<8x!tpu.dma_semaphore, #tpu.memory_space<semaphore_mem>> -> memref<1x!tpu.dma_semaphore, #tpu.memory_space<semaphore_mem>>
      %57 = tpu.memref_squeeze %56 : memref<1x!tpu.dma_semaphore, #tpu.memory_space<semaphore_mem>> -> memref<!tpu.dma_semaphore, #tpu.memory_space<semaphore_mem>>
      tpu.wait_dma2 semaphore(%57 : memref<!tpu.dma_semaphore, #tpu.memory_space<semaphore_mem>>) src(%54 : memref<1x16xf32, #tpu.memory_space<any>>) dst(%55 : memref<1x16xf32, #tpu.memory_space<vmem>>)
    }
    %c8_i32_5 = arith.constant 8 : i32
    %c0 = arith.constant 0 : index
    %c0_6 = arith.constant 0 : index
    %3 = vector.load %arg2[%c0, %c0_6] : memref<8x16xf32, #tpu.memory_space<vmem>>, vector<8x16xf32>
    %c0_7 = arith.constant 0 : index
    %c0_8 = arith.constant 0 : index
    %4 = vector.load %arg6[%c0_7, %c0_8] : memref<8x16xf32, #tpu.memory_space<vmem>>, vector<8x16xf32>
    %c0_9 = arith.constant 0 : index
    %c0_10 = arith.constant 0 : index
    %5 = vector.load %arg3[%c0_9, %c0_10] : memref<8x1xi32, #tpu.memory_space<vmem>>, vector<8x1xi32>
    %6 = tpu.iota {dimensions = array<i32: 1>} : vector<8x16xi32>
    %7 = vector.broadcast %5 : vector<8x1xi32> to vector<8x16xi32>
    %8 = arith.cmpi eq, %7, %6 : vector<8x16xi32>
    %9 = arith.extui %8 : vector<8x16xi1> to vector<8x16xi32>
    %10 = arith.sitofp %9 : vector<8x16xi32> to vector<8x16xf32>
    %cst = arith.constant dense<0xFF800000> : vector<8xf32>
    %11 = vector.multi_reduction <maximumf>, %3, %cst [1] : vector<8x16xf32> to vector<8xf32>
    %12 = vector.shape_cast %11 : vector<8xf32> to vector<8x1xf32>
    %13 = vector.broadcast %12 : vector<8x1xf32> to vector<8x16xf32>
    %14 = arith.subf %3, %13 : vector<8x16xf32>
    %15 = math.exp %14 : vector<8x16xf32>
    %cst_11 = arith.constant dense<0.000000e+00> : vector<8xf32>
    %16 = vector.multi_reduction <add>, %15, %cst_11 [1] : vector<8x16xf32> to vector<8xf32>
    %17 = vector.shape_cast %16 : vector<8xf32> to vector<8x1xf32>
    %18 = math.log %17 : vector<8x1xf32>
    %19 = arith.addf %12, %18 : vector<8x1xf32>
    %20 = arith.mulf %3, %10 : vector<8x16xf32>
    %cst_12 = arith.constant dense<0.000000e+00> : vector<8xf32>
    %21 = vector.multi_reduction <add>, %20, %cst_12 [1] : vector<8x16xf32> to vector<8xf32>
    %22 = vector.shape_cast %21 : vector<8xf32> to vector<8x1xf32>
    %23 = arith.subf %19, %22 : vector<8x1xf32>
    %24 = arith.mulf %3, %3 : vector<8x16xf32>
    %cst_13 = arith.constant dense<0.000000e+00> : vector<8xf32>
    %25 = vector.multi_reduction <add>, %24, %cst_13 [1] : vector<8x16xf32> to vector<8xf32>
    %26 = vector.shape_cast %25 : vector<8xf32> to vector<8x1xf32>
    %27 = arith.mulf %4, %4 : vector<8x16xf32>
    %cst_14 = arith.constant dense<0.000000e+00> : vector<8xf32>
    %28 = vector.multi_reduction <add>, %27, %cst_14 [1] : vector<8x16xf32> to vector<8xf32>
    %29 = vector.shape_cast %28 : vector<8xf32> to vector<8x1xf32>
    %30 = arith.mulf %3, %4 : vector<8x16xf32>
    %cst_15 = arith.constant dense<0.000000e+00> : vector<8xf32>
    %31 = vector.multi_reduction <add>, %30, %cst_15 [1] : vector<8x16xf32> to vector<8xf32>
    %32 = vector.shape_cast %31 : vector<8xf32> to vector<8x1xf32>
    %33 = arith.addf %26, %29 : vector<8x1xf32>
    %cst_16 = arith.constant 2.000000e+00 : f32
    %34 = vector.broadcast %cst_16 : f32 to vector<8x1xf32>
    %35 = arith.mulf %34, %32 : vector<8x1xf32>
    %36 = arith.subf %33, %35 : vector<8x1xf32>
    %cst_17 = arith.constant 9.99999996E-13 : f32
    %cst_18 = arith.constant 9.99999995E+11 : f32
    %37 = vector.broadcast %cst_17 : f32 to vector<8x1xf32>
    %38 = arith.maximumf %37, %36 : vector<8x1xf32>
    %39 = vector.broadcast %cst_18 : f32 to vector<8x1xf32>
    %40 = arith.minimumf %39, %38 : vector<8x1xf32>
    %cst_19 = arith.constant 1.500000e-11 : f32
    %41 = vector.broadcast %cst_19 : f32 to vector<8x1xf32>
    %42 = arith.addf %40, %41 : vector<8x1xf32>
    %cst_20 = arith.constant 5.000000e-01 : f32
    %43 = vector.broadcast %cst_20 : f32 to vector<8x1xf32>
    %44 = arith.mulf %43, %42 : vector<8x1xf32>
    %45 = arith.addf %23, %44 : vector<8x1xf32>
    %46 = vector.shape_cast %45 : vector<8x1xf32> to vector<1x8x1xf32>
    %cst_21 = arith.constant dense<0.000000e+00> : vector<1xf32>
    %47 = vector.multi_reduction <add>, %46, %cst_21 [1, 2] : vector<1x8x1xf32> to vector<1xf32>
    %48 = vector.shape_cast %47 : vector<1xf32> to vector<1x1x1xf32>
    %49 = vector.extract %48[0, 0, 0] : f32 from vector<1x1x1xf32>
    %50 = vector.broadcast %49 : f32 to vector<1x8x128xf32>
    %c0_22 = arith.constant 0 : index
    %c0_23 = arith.constant 0 : index
    %c0_24 = arith.constant 0 : index
    %51 = vector.load %arg5[%c0_22, %c0_23, %c0_24] : memref<1x8x128xf32, #tpu.memory_space<vmem>>, vector<1x8x128xf32>
    tpu.vector_store %arg5[%c0_22, %c0_23, %c0_24], %50 {strides = array<i32>} : memref<1x8x128xf32, #tpu.memory_space<vmem>>, vector<1x8x128xf32>,
    return
  }
  func.func @transform_0(%arg0: i32, %arg1: memref<8xi32, #tpu.memory_space<smem>>) -> (i32, i32) {
    %c0_i32 = arith.constant 0 : i32
    %c0_i32_0 = arith.constant 0 : i32
    return %arg0, %c0_i32 : i32, i32
  }
  func.func @transform_1(%arg0: i32, %arg1: memref<8xi32, #tpu.memory_space<smem>>) -> (i32, i32) {
    %c0_i32 = arith.constant 0 : i32
    %c0_i32_0 = arith.constant 0 : i32
    return %arg0, %c0_i32 : i32, i32
  }
  func.func @transform_3(%arg0: i32, %arg1: memref<8xi32, #tpu.memory_space<smem>>) -> (i32, i32, i32) {
    %c0_i32 = arith.constant 0 : i32
    %c0_i32_0 = arith.constant 0 : i32
    %c0_i32_1 = arith.constant 0 : i32
    return %arg0, %c0_i32, %c0_i32_0 : i32, i32, i32
  }
}

</mosaic_0001>

<bundles_post_ra>
// kernel: tpu_custom_call.1
= control target key start
LH: loop header
LB: loop body
LE: loop exit
PB: predicated region body
PF: predicated region fallthrough
CT: control target
= control target key end

     0   :  { %s440_s0 = inlined_call_operand.vmem [shape: s32[8], index: 0, kind: input, shape index: {}]   ;;  %s441_s1 = inlined_call_operand.hbm [shape: f32[8,16], index: 1, kind: input, shape index: {}]   ;;  %s442_s2 = inlined_call_operand.vmem [shape: s32[8,1], index: 2, kind: input, shape index: {}]   ;;  %s443_s3 = inlined_call_operand.vmem [shape: f32[16,16], index: 3, kind: input, shape index: {}]   ;;  %s444_s4 = inlined_call_operand.hbm [shape: f32[1,8,128], index: 4, kind: output, shape index: {}]  }
   0x1   :  { %s9_s17 = sshll.u32 %s440_s0, 4  ;;  %s10_s17 = int_to_ptr.vmem [resolvable:$true] %s9_s17 }
   0x2   :  { %s291_s18 = scalar_lea.vmem %s10_s17, 16  ;;  %p296_p1 = scmp.lt.s32.totalorder %s10_s17, %s10_s17 }
   0x3   :  { %p292_p0 = scmp.ne.s32.totalorder %s10_s17, %s291_s18  ;;  %p297_p2 = scmp.lt.s32.totalorder %s291_s18, %s291_s18 }
   0x5   :  { %p298_p3 = por %p297_p2, %p296_p1 }
   0x7   :  { %p299_p4 = pnand %p298_p3, %p292_p0 }
   0x9   :  { %302 = shalt.err (!%p299_p4)  }
   0xa   :  { %s371_s19 = smov [#allocation5]  }
   0xb   :  { %12 = dma.vmem_to_smem %s10_s17, 16, %s371_s19, [#allocation4] }
   0xc   :  { %355 = dma.done.wait [#allocation4], 16 }
   0xd   :  { %356 = vsyncadd [#allocation4], 4294967280 }
   0xe   :  { %14 = sfence }
   0xf   :  { %15 = vsyncpa [#allocation7], 0 }
  0x10   :  { %16 = vsyncpa [#allocation8], 0  ;;  %s372_s20 = smov [#allocation6]   ;;  %s303_s23 = scalar_lea.hbm %s441_s1, 128 }
  0x11   :  { %s23_s21 = sshll.u32 %s372_s20, 4  ;;  %p304_p5 = scmp.ne.s32.totalorder %s441_s1, %s303_s23  ;;  %s24_s21 = int_to_ptr.vmem [resolvable:$true] %s23_s21 }
  0x12   :  { %p307_p6 = scmp.lt.u32.totalorder %s303_s23, %s441_s1 }
  0x14   :  { %p309_p7 = pnand %p307_p6, %p304_p5 }
  0x16   :  { %312 = shalt.err (!%p309_p7)
}
  0x17   :  { %s313_s28 = scalar_lea.vmem %s24_s21, 128  ;;  %p318_p9 = scmp.lt.s32.totalorder %s24_s21, %s24_s21 }
  0x18   :  { %p314_p8 = scmp.ne.s32.totalorder %s24_s21, %s313_s28  ;;  %p319_p10 = scmp.lt.s32.totalorder %s313_s28, %s313_s28 }
  0x1a   :  { %p320_p11 = por %p319_p10, %p318_p9 }
  0x1c   :  { %p321_p12 = pnand %p320_p11, %p314_p8 }
  0x1e   :  { %324 = shalt.err (!%p321_p12)
}
  0x1f   :  { %26 = dma.hbm_to_vmem [thread:$0]  %s441_s1, 128, %s24_s21, [#allocation7]  }
  0x20   :  { %357 = dma.done.wait [#allocation7], 128  }
  0x21   :  { %358 = vsyncadd [#allocation7], 4294967168  ;;  %s363_s5 = smov 0  }
  0x22 LB: > { %s40_s6 = sld [smem:[#allocation5 + %s365_s5]]  ;;  %s42_s10 = scalar_lea.vmem [#allocation2], %s365_s5  ;;  %s365_s5 = sphi %s363_s5, %s38_s5  }
  0x23   : > { %s43_s11 = scalar_lea.sflag [#allocation3], %s365_s5 }
  0x28   : > { %s41_s9 = scalar_lea.vmem %s443_s3, %s40_s6 }
  0x29   : > { %v61_v0 = vld [vmem:[%s41_s9] sm:$0x1] }
  0x2a   : > { %62 = vst [vmem:[%s42_s10] sm:$0x1] %v61_v0 }
  0x2b   : > { %87 = vsyncadd %s43_s11, 16  ;;  %s38_s5 = sadd.s32 1, %s365_s5  }
  0x2c   : > { %p35_p13 = scmp.ge.s32.totalorder %s38_s5, 8  }
  0x2d   :  { %s367_s1 = smov (%p35_p13), 0  }
  0x2e   :  { %37 = sbr.rel (!%p35_p13) target bundleno = 34 (0x22), region = 97 }
  0x35 LB: > { %s94_s12 = scalar_lea.sflag [#allocation3], %s369_s1  ;;  %s369_s1 = sphi %s367_s1, %s93_s1  }
  0x36   : > { %359 = dma.done.wait %s94_s12, 16 }
  0x37   : > { %360 = vsyncadd %s94_s12, 4294967280  ;;  %s93_s1 = sadd.s32 1, %s369_s1  }
  0x38   : > { %p90_p0 = scmp.ge.s32.totalorder %s93_s1, 8  }
  0x39   :  { %v98_v1 = vld [vmem:[#allocation6] sm:$0xff] (%p90_p0)  ;;  %vm109_vm0 = vcmask (%p90_p0), 130048   ;;  %v373_v3 = vmov (%p90_p0), 0   ;;  %v100_v5 = vld [vmem:[%s442_s2] sm:$0xff] (%p90_p0)  ;;  %v101_v10 = vlaneseq (%p90_p0)  ;;  %v374_v19 = vmov (%p90_p0), 0.0   ;;  %s375_s2 = smov (%p90_p0), [#allocation9]  }
  0x3a   :  { %92 = sbr.rel (!%p90_p0) target bundleno = 53 (0x35), region = 108  ;;  %v110_v2 = vsel (%p90_p0), %vm109_vm0, %v98_v1, -inf  ;;  %286 = vset.pattern.permute.xlu0 (%p90_p0), %v373_v3  ;;  %v127_v4 = vmul.f32 (%p90_p0), %v98_v1, %v98_v1  ;;  %v99_v11 = vld [vmem:[#allocation2] sm:$0xff] (%p90_p0)  ;;  %vm147_vm2 = vcmask (%p90_p0), 7168   ;;  %s166_s14 = sshll.u32 (%p90_p0), %s375_s2, 4  ;;  %s167_s14 = int_to_ptr.vmem [resolvable:$true] %s166_s14 }
  0x3b   :  { %111 = vmax.xlane.f32.xlu0 (%p90_p0), %v110_v2  ;;  %v102_v12 = vand.u32 (%p90_p0), 127, %v101_v10  ;;  %v131_v14 = vmul.f32 (%p90_p0), %v99_v11, %v99_v11  ;;  %v135_v18 = vmul.f32 (%p90_p0), %v99_v11, %v98_v1  ;;  %s325_s16 = scalar_lea.vmem (%p90_p0), %s167_s14, 128  ;;  %p330_p2 = scmp.lt.s32.totalorder (%p90_p0), %s167_s14, %s167_s14 }
  0x3c   :  { %v128_v6 = vsel (%p90_p0), %vm109_vm0, %v127_v4, 0.0  ;;  %p326_p1 = scmp.ne.s32.totalorder (%p90_p0), %s167_s14, %s325_s16  ;;  %p331_p3 = scmp.lt.s32.totalorder (%p90_p0), %s325_s16, %s325_s16 }
  0x3d   :  { %129 = vadd.xlane.f32.xlu1 (%p90_p0), %v128_v6  ;;  %v132_v17 = vsel (%p90_p0), %vm109_vm0, %v131_v14, 0.0  ;;  %v136_v21 = vsel (%p90_p0), %vm109_vm0, %v135_v18, 0.0 }
  0x3e   :  { %p332_p4 = por (%p90_p0), %p331_p3, %p330_p2 }
  0x40   :  { %p333_p5 = pnand (%p90_p0), %p332_p4, %p326_p1 }
  0x51   :  { %104 = vperm.xlu0 %286, %v100_v5  }
  0xc8   :  { %v112_v7 = vpop.xlane.xlu0 %111 }
  0xc9   :  { %v113_v8 = vsub.f32 %v98_v1, %v112_v7 }
  0xca   :  { %v130_v24 = vpop.xlane.xlu1 %129 }
  0xcb   :  { %v114_v9 = vmul.f32 1.442695, %v113_v8 }
  0xcd   :  { %287 = vpow2.f32 %v114_v9 }
  0xd0   :  { %v105_v13 = vpop.permute.xlu0 %104 }
  0xd1   :  { %vm106_vm1 = vcmp.eq.s32.totalorder %v105_v13, %v102_v12 }
  0xd2   :  { %v254_v20 = vsel %vm106_vm1, 1.0, %v374_v19 }
  0xd3   :  { %v122_v22 = vmul.f32 %v254_v20, %v98_v1 }
  0xd5   :  { %v123_v23 = vsel %vm109_vm0, %v122_v22, 0.0 }
  0xd7   :  { %v288_v15 = vpop.eup %287 }
  0xd8   :  { %v116_v16 = vsel %vm109_vm0, %v288_v15, 0.0 }
  0xd9   :  { %117 = vadd.xlane.f32.xlu1 %v116_v16 }
  0xdd   :  { %133 = vadd.xlane.f32.xlu1 %v132_v17 }
  0xe1   :  { %137 = vadd.xlane.f32.xlu1 %v136_v21 }
  0xe5   :  { %124 = vadd.xlane.f32.xlu1 %v123_v23 }
 0x166   :  { %v118_v25 = vpop.xlane.xlu1 %117 }
 0x167   :  { %289 = vlog2.f32 %v118_v25 }
 0x16a   :  { %v134_v26 = vpop.xlane.xlu1 %133 }
 0x16b   :  { %v139_v28 = vadd.f32 %v134_v26, %v130_v24 }
 0x16e   :  { %v138_v27 = vpop.xlane.xlu1 %137 }
 0x16f   :  { %v140_v29 = vmul.f32 2.0, %v138_v27 }
 0x171   :  { %v290_v30 = vpop.eup %289  ;;  %v141_v31 = vsub.f32 %v139_v28, %v140_v29 }
 0x172   :  { %v120_v32 = vmul.f32 0.6931472, %v290_v30  ;;  %v125_v36 = vpop.xlane.xlu1 %124 }
 0x173   :  { %v142_v33 = vmax.f32 %v141_v31, 1e-12 }
 0x174   :  { %v121_v35 = vadd.f32 %v120_v32, %v112_v7 }
 0x175   :  { %v143_v34 = vmin.f32 %v142_v33, 1e+12 }
 0x176   :  { %v126_v38 = vsub.f32 %v121_v35, %v125_v36 }
 0x177   :  { %v144_v37 = vadd.f32 1.5e-11, %v143_v34 }
 0x179   :  { %v145_v39 = vmul.f32 0.5, %v144_v37 }
 0x17b   :  { %v146_v40 = vadd.f32 %v145_v39, %v126_v38 }
 0x17d   :  { %v148_v41 = vsel %vm147_vm2, %v146_v40, 0.0 }
 0x17e   :  { %149 = vadd.xlane.f32.xlu1 %v148_v41 }
 0x20b   :  { %v150_v42 = vpop.xlane.xlu1 %149 }
 0x20c   :  { %v151_v43 = vrot.slane %v150_v42, 4 }
 0x20e   :  { %v152_v44 = vadd.f32 %v151_v43, %v150_v42 }
 0x210   :  { %v153_v45 = vrot.slane %v152_v44, 2 }
 0x212   :  { %v154_v46 = vadd.f32 %v153_v45, %v152_v44 }
 0x214   :  { %v155_v47 = vrot.slane %v154_v46, 1 }
 0x216   :  { %v156_v48 = vadd.f32 %v155_v47, %v154_v46 }
 0x218   :  { %263 = vpush %v156_v48 }
 0x249   :  { %s264_s15 = spop %263 }
 0x24a   :  { %v158_v49 = vstv %s264_s15 }
 0x24b   :  { %159 = vst [vmem:[#allocation9] sm:$0xff] %v158_v49 }
 0x24c   :  { %336 = shalt.err (!%p333_p5)
}
 0x24d   :  { %s337_s19 = scalar_lea.hbm %s444_s4, 128 }
 0x24e   :  { %p338_p6 = scmp.ne.s32.totalorder %s444_s4, %s337_s19  ;;  %p341_p7 = scmp.lt.u32.totalorder %s337_s19, %s444_s4 }
 0x250   :  { %p343_p8 = pnand %p341_p7, %p338_p6 }
 0x252   :  { %346 = shalt.err (!%p343_p8)
}
 0x253   :  { %169 = dma.vmem_to_hbm [thread:$0]  %s167_s14, 128, %s444_s4, [#allocation8]  }
 0x254   :  { %361 = dma.done.wait [#allocation8], 128  }
 0x255   :  { %362 = vsyncadd [#allocation8], 4294967168 }
 0x256   :  { %173 = vsyncpa [#allocation7], 1 }
 0x257   :  { %174 = vsyncpa [#allocation8], 1 }
 0x258   :  { %175 = vsyncmov [#allocation3] }
 0x25b   :  { %s176_s25 = vpop.sfrf %175 }
 0x25c   :  { %p255_p9 = scmp.ne.s32.totalorder %s176_s25, 0 }
 0x25e   :  { %180 = shalt.err (%p255_p9)  }
 0x25f   :  { %182 = vsyncmov [#allocation3 + $0x1] }
 0x262   :  { %s183_s26 = vpop.sfrf %182 }
 0x263   :  { %p256_p10 = scmp.ne.s32.totalorder %s183_s26, 0 }
 0x265   :  { %187 = shalt.err (%p256_p10)  }
 0x266   :  { %189 = vsyncmov [#allocation3 + $0x2] }
 0x269   :  { %s190_s27 = vpop.sfrf %189 }
 0x26a   :  { %p257_p11 = scmp.ne.s32.totalorder %s190_s27, 0 }
 0x26c   :  { %194 = shalt.err (%p257_p11)  }
 0x26d   :  { %196 = vsyncmov [#allocation3 + $0x3] }
 0x270   :  { %s197_s28 = vpop.sfrf %196 }
 0x271   :  { %p258_p12 = scmp.ne.s32.totalorder %s197_s28, 0 }
 0x273   :  { %201 = shalt.err (%p258_p12)  }
 0x274   :  { %203 = vsyncmov [#allocation3 + $0x4] }
 0x277   :  { %s204_s4 = vpop.sfrf %203 }
 0x278   :  { %p259_p13 = scmp.ne.s32.totalorder %s204_s4, 0 }
 0x27a   :  { %208 = shalt.err (%p259_p13)  }
 0x27b   :  { %210 = vsyncmov [#allocation3 + $0x5] }
 0x27e   :  { %s211_s29 = vpop.sfrf %210 }
 0x27f   :  { %p260_p0 = scmp.ne.s32.totalorder %s211_s29, 0 }
 0x281   :  { %215 = shalt.err (%p260_p0)  }
 0x282   :  { %217 = vsyncmov [#allocation3 + $0x6] }
 0x285   :  { %s218_s30 = vpop.sfrf %217 }
 0x286   :  { %p261_p1 = scmp.ne.s32.totalorder %s218_s30, 0 }
 0x288   :  { %222 = shalt.err (%p261_p1)  }
 0x289   :  { %224 = vsyncmov [#allocation3 + $0x7] }
 0x28c   :  { %s225_s5 = vpop.sfrf %224 }
 0x28d   :  { %p262_p2 = scmp.ne.s32.totalorder %s225_s5, 0 }
 0x28f   :  { %229 = shalt.err (%p262_p2)  }

</bundles_post_ra>
